<compile_context>
chip_gen: v7x
topology: tpu7x:2x2x1
jax: 0.10.0
libtpu: 0.0.40
codegen_flags: <defaults>
</compile_context>

<pallas_src>
import functools
import math
from dataclasses import dataclass

import jax
import jax.numpy as jnp
from jax.experimental import pallas as pl
from jax.experimental.pallas import tpu as pltpu

_USE_PALLAS = True  # flipped to False in __main__ to build a pure-jnp reference


# ---------------------------------------------------------------------------
# Pallas kernels
# ---------------------------------------------------------------------------
def _linear_kernel_single(x_ref, w_ref, b_ref, o_ref):
    # Single k-step: x (tm, K), w (K, tn), b (1, tn) f32, o (tm, tn).
    acc = jnp.dot(x_ref[...], w_ref[...], preferred_element_type=jnp.float32)
    o_ref[...] = (acc + b_ref[...]).astype(o_ref.dtype)


def _linear_kernel_ksplit(x_ref, w_ref, b_ref, o_ref, acc_ref):
    # k-split: grid (i, j, k), f32 accumulator resident across k.
    @pl.when(pl.program_id(2) == 0)
    def _():
        acc_ref[...] = jnp.zeros_like(acc_ref)

    acc_ref[...] += jnp.dot(x_ref[...], w_ref[...],
                            preferred_element_type=jnp.float32)

    @pl.when(pl.program_id(2) == pl.num_programs(2) - 1)
    def _():
        o_ref[...] = (acc_ref[...] + b_ref[...]).astype(o_ref.dtype)


def _rmsnorm_kernel(x_ref, w_ref, o_ref, *, eps):
    x = x_ref[...].astype(jnp.float32)
    var = jnp.mean(x * x, axis=-1, keepdims=True)
    y = x * jax.lax.rsqrt(var + eps)
    w = w_ref[...]
    o_ref[...] = (y.astype(w.dtype) * w).astype(o_ref.dtype)


# ---------------------------------------------------------------------------
# Wrappers
# ---------------------------------------------------------------------------
def _pick_tile(dim, full_cap, candidates, pad_align):
    """Block size for `dim`: whole dim if small, else largest dividing
    candidate, else pad_align blocks with the dim padded up."""
    if dim <= full_cap:
        return dim, dim
    for c in candidates:
        if dim % c == 0:
            return c, dim
    padded = ((dim + pad_align - 1) // pad_align) * pad_align
    return pad_align, padded


def pallas_linear(x, weight_t, bias=None):
    """y = x @ weight_t (+ bias).  x: [..., K], weight_t: [K, N] -> [..., N]."""
    *lead, K = x.shape
    K_w, N = weight_t.shape
    assert K == K_w, "in_features mismatch"
    M = 1
    for d in lead:
        M *= d
    x2d = x.reshape(M, K)

    if not _USE_PALLAS:  # pure-jnp reference path (same math)
        y = jnp.dot(x2d, weight_t, preferred_element_type=jnp.float32)
        if bias is not None:
            y = y + bias.astype(jnp.float32)[None, :]
        return y.astype(x.dtype).reshape(*lead, N)

    tm, M_pad = _pick_tile(M, 256, (256, 128), 128)
    tn, N_pad = _pick_tile(N, 256, (512, 256, 128), 128)
    tk, K_pad = _pick_tile(K, 2048, (2048, 1024, 512), 512)

    if (M_pad, K_pad) != (M, K):
        x2d = jnp.pad(x2d, ((0, M_pad - M), (0, K_pad - K)))
    if (K_pad, N_pad) != (K, N):
        weight_t = jnp.pad(weight_t, ((0, K_pad - K), (0, N_pad - N)))
    if bias is None:
        bias2d = jnp.zeros((1, N_pad), jnp.float32)
    else:
        bias2d = bias.astype(jnp.float32).reshape(1, N)
        if N_pad != N:
            bias2d = jnp.pad(bias2d, ((0, 0), (0, N_pad - N)))

    gm, gn, gk = M_pad // tm, N_pad // tn, K_pad // tk
    dsize = x2d.dtype.itemsize
    osize = jnp.dtype(x.dtype).itemsize
    vmem = (2 * (tm * tk + tk * tn) * dsize + 2 * tm * tn * osize
            + 2 * tn * 4 + (tm * tn * 4 if gk > 1 else 0))
    cparams = pltpu.CompilerParams(
        dimension_semantics=("parallel", "parallel")
        + (("arbitrary",) if gk > 1 else ()),
        vmem_limit_bytes=min(int(vmem * 1.5) + (4 << 20), 100 << 20),
    )

    if gk == 1:
        # One shot: full K resident, no accumulator loop at all.
        out2d = pl.pallas_call(
            _linear_kernel_single,
            out_shape=jax.ShapeDtypeStruct((M_pad, N_pad), x.dtype),
            grid_spec=pltpu.PrefetchScalarGridSpec(
                num_scalar_prefetch=0,
                grid=(gm, gn),
                in_specs=[
                    pl.BlockSpec((tm, K_pad), lambda i, j: (i, 0)),
                    pl.BlockSpec((K_pad, tn), lambda i, j: (0, j)),
                    pl.BlockSpec((1, tn), lambda i, j: (0, j)),
                ],
                out_specs=pl.BlockSpec((tm, tn), lambda i, j: (i, j)),
            ),
            compiler_params=cparams,
        )(x2d, weight_t, bias2d)
    else:
        out2d = pl.pallas_call(
            _linear_kernel_ksplit,
            out_shape=jax.ShapeDtypeStruct((M_pad, N_pad), x.dtype),
            grid_spec=pltpu.PrefetchScalarGridSpec(
                num_scalar_prefetch=0,
                grid=(gm, gn, gk),
                in_specs=[
                    pl.BlockSpec((tm, tk), lambda i, j, k: (i, k)),
                    pl.BlockSpec((tk, tn), lambda i, j, k: (k, j)),
                    pl.BlockSpec((1, tn), lambda i, j, k: (0, j)),
                ],
                out_specs=pl.BlockSpec((tm, tn), lambda i, j, k: (i, j)),
                scratch_shapes=[pltpu.VMEM((tm, tn), jnp.float32)],
            ),
            compiler_params=cparams,
        )(x2d, weight_t, bias2d)

    if (M_pad, N_pad) != (M, N):
        out2d = out2d[:M, :N]
    return out2d.reshape(*lead, N)


def pallas_rmsnorm(x, weight, eps=1e-6):
    *lead, D = x.shape
    M = 1
    for d in lead:
        M *= d
    x2d = x.reshape(M, D)
    out_dtype = weight.dtype

    if not _USE_PALLAS:  # pure-jnp reference path
        xf = x2d.astype(jnp.float32)
        y = xf * jax.lax.rsqrt(jnp.mean(xf * xf, axis=-1, keepdims=True) + eps)
        return (y.astype(out_dtype) * weight[None, :]).reshape(*lead, D)

    tm, M_pad = _pick_tile(M, 256, (256, 128), 128)
    if M_pad != M:
        x2d = jnp.pad(x2d, ((0, M_pad - M), (0, 0)))
    w2d = weight.reshape(1, D)

    out2d = pl.pallas_call(
        functools.partial(_rmsnorm_kernel, eps=eps),
        out_shape=jax.ShapeDtypeStruct((M_pad, D), out_dtype),
        grid_spec=pltpu.PrefetchScalarGridSpec(
            num_scalar_prefetch=0,
            grid=(M_pad // tm,),
            in_specs=[
                pl.BlockSpec((tm, D), lambda i: (i, 0)),
                pl.BlockSpec((1, D), lambda i: (0, 0)),
            ],
            out_specs=pl.BlockSpec((tm, D), lambda i: (i, 0)),
        ),
        compiler_params=pltpu.CompilerParams(dimension_semantics=("parallel",)),
    )(x2d, w2d)
    if M_pad != M:
        out2d = out2d[:M]
    return out2d.reshape(*lead, D)


# ---------------------------------------------------------------------------
# Model modules (forward semantics of the PyTorch reference, world_size == 1)
# ---------------------------------------------------------------------------
@dataclass
class ModelArgs:
    max_batch_size: int = 8
    max_seq_len: int = 64
    dim: int = 64
    inter_dim: int = 128
    n_dense_layers: int = 1
    n_heads: int = 2
    q_lora_rank: int = 32
    kv_lora_rank: int = 32
    qk_nope_head_dim: int = 16
    qk_rope_head_dim: int = 8
    v_head_dim: int = 16
    original_seq_len: int = 64
    rope_theta: float = 10000.0
    rope_factor: float = 40.0
    mscale: float = 1.0


class Linear:
    """F.linear(x, W, b) with W stored pre-transposed [K, N] for the kernel."""

    def __init__(self, in_features, out_features, bias=False,
                 dtype=jnp.float32, key=None):
        self.in_features = in_features
        self.out_features = out_features
        if key is None:
            key = jax.random.PRNGKey(0)
        wkey, bkey = jax.random.split(key)
        bound = 1.0 / math.sqrt(in_features)
        w = jax.random.uniform(wkey, (out_features, in_features), jnp.float32,
                               minval=-bound, maxval=bound).astype(dtype)
        self.weight = w                        # [N, K] (PyTorch convention)
        self.weight_t = jnp.asarray(w.T)       # [K, N], transposed once
        self.scale = None                      # fp8 path unsupported (as ref)
        if bias:
            self.bias = jax.random.uniform(bkey, (out_features,), jnp.float32,
                                           minval=-bound, maxval=bound).astype(dtype)
        else:
            self.bias = None

    def __call__(self, x):
        return pallas_linear(x, self.weight_t, self.bias)


class RMSNorm:
    def __init__(self, dim, eps=1e-6, dtype=jnp.float32):
        self.eps = eps
        self.weight = jnp.ones((dim,), dtype)

    def __call__(self, x):
        return pallas_rmsnorm(x, self.weight, self.eps)


def apply_rotary_emb(x, freqs_cis):
    # x: (b, s, h, d) with d even; freqs_cis: (s, d//2) complex64
    dtype = x.dtype
    xf = x.astype(jnp.float32).reshape(*x.shape[:-1], -1, 2)
    xc = jax.lax.complex(xf[..., 0], xf[..., 1])
    fc = freqs_cis.reshape(1, x.shape[1], 1, -1)
    y = xc * fc
    out = jnp.stack([jnp.real(y), jnp.imag(y)], axis=-1).reshape(x.shape)
    return out.astype(dtype)


def precompute_freqs_cis(seqlen, rope_dim, theta=10000.0):
    freqs = 1.0 / (theta ** (jnp.arange(0, rope_dim, 2, dtype=jnp.float32) / rope_dim))
    ang = jnp.outer(jnp.arange(seqlen, dtype=jnp.float32), freqs)
    return jax.lax.complex(jnp.cos(ang), jnp.sin(ang))


class MLA:
    """Multi-head latent attention ('naive' attn_impl path)."""

    def __init__(self, args, key):
        self.dim = args.dim
        self.n_local_heads = args.n_heads  # world_size == 1
        self.q_lora_rank = args.q_lora_rank
        self.kv_lora_rank = args.kv_lora_rank
        self.qk_nope_head_dim = args.qk_nope_head_dim
        self.qk_rope_head_dim = args.qk_rope_head_dim
        self.qk_head_dim = args.qk_nope_head_dim + args.qk_rope_head_dim
        self.v_head_dim = args.v_head_dim
        keys = jax.random.split(key, 6)
        if self.q_lora_rank == 0:
            self.wq = Linear(self.dim, self.n_local_heads * self.qk_head_dim, key=keys[0])
        else:
            self.wq_a = Linear(self.dim, self.q_lora_rank, key=keys[0])
            self.q_norm = RMSNorm(self.q_lora_rank)
            self.wq_b = Linear(self.q_lora_rank, self.n_local_heads * self.qk_head_dim, key=keys[1])
        self.wkv_a = Linear(self.dim, self.kv_lora_rank + self.qk_rope_head_dim, key=keys[2])
        self.kv_norm = RMSNorm(self.kv_lora_rank)
        self.wkv_b = Linear(self.kv_lora_rank,
                            self.n_local_heads * (self.qk_nope_head_dim + self.v_head_dim),
                            key=keys[3])
        self.wo = Linear(self.n_local_heads * self.v_head_dim, self.dim, key=keys[4])
        self.softmax_scale = self.qk_head_dim ** (-0.5)
        if args.max_seq_len > args.original_seq_len:
            mscale = 0.1 * args.mscale * math.log(args.rope_factor) + 1.0
            self.softmax_scale = self.softmax_scale * mscale * mscale

    def __call__(self, x, start_pos, freqs_cis, mask):
        # TODO(synk): KV cache for start_pos > 0 not implemented; this is a
        # single-shot prefill from position 0 (identical math for that case).
        bsz, seqlen, _ = x.shape
        if self.q_lora_rank == 0:
            q = self.wq(x)
        else:
            q = self.wq_b(self.q_norm(self.wq_a(x)))
        q = q.reshape(bsz, seqlen, self.n_local_heads, self.qk_head_dim)
        q_nope = q[..., :self.qk_nope_head_dim]
        q_pe = apply_rotary_emb(q[..., self.qk_nope_head_dim:], freqs_cis)
        kv = self.wkv_a(x)
        kv, k_pe = kv[..., :self.kv_lora_rank], kv[..., self.kv_lora_rank:]
        k_pe = apply_rotary_emb(k_pe[:, :, None, :], freqs_cis)

        q = jnp.concatenate([q_nope, q_pe], axis=-1)
        kv = self.wkv_b(self.kv_norm(kv))
        kv = kv.reshape(bsz, seqlen, self.n_local_heads,
                        self.qk_nope_head_dim + self.v_head_dim)
        k_nope = kv[..., :self.qk_nope_head_dim]
        v = kv[..., self.qk_nope_head_dim:]
        k = jnp.concatenate(
            [k_nope,
             jnp.broadcast_to(k_pe, (bsz, seqlen, self.n_local_heads,
                                     self.qk_rope_head_dim))], axis=-1)

        scores = jnp.einsum('bshd,bthd->bsht', q, k) * self.softmax_scale
        if mask is not None:
            scores = scores + mask[:, None, :]
        scores = jax.nn.softmax(scores.astype(jnp.float32), axis=-1).astype(x.dtype)
        out = jnp.einsum('bsht,bthd->bshd', scores, v)
        return self.wo(out.reshape(bsz, seqlen, -1))


class MLP:
    def __init__(self, dim, inter_dim, key):
        k1, k2, k3 = jax.random.split(key, 3)
        self.w1 = Linear(dim, inter_dim, key=k1)
        self.w2 = Linear(inter_dim, dim, key=k2)
        self.w3 = Linear(dim, inter_dim, key=k3)

    def __call__(self, x):
        return self.w2(jax.nn.silu(self.w1(x)) * self.w3(x))


class Block:
    def __init__(self, layer_id, args, key):
        k_attn, k_ffn = jax.random.split(key)
        self.attn = MLA(args, k_attn)
        if layer_id < args.n_dense_layers:
            self.ffn = MLP(args.dim, args.inter_dim, k_ffn)
        else:
            # TODO(synk): MoE path (Gate + routed Experts, data-dependent
            # dispatch) not implemented; this demo Block is the dense layer.
            raise NotImplementedError("MoE ffn not implemented in this script")
        self.attn_norm = RMSNorm(args.dim)
        self.ffn_norm = RMSNorm(args.dim)

    def __call__(self, x, start_pos, freqs_cis, mask):
        x = x + self.attn(self.attn_norm(x), start_pos, freqs_cis, mask)
        x = x + self.ffn(self.ffn_norm(x))
        return x


# ---------------------------------------------------------------------------
if __name__ == "__main__":
    args = ModelArgs()
    batch, seqlen, start_pos = 2, 8, 0

    root = jax.random.PRNGKey(0)
    k_x, k_blk = jax.random.split(root)
    x = jax.random.normal(k_x, (batch, seqlen, args.dim), dtype=jnp.float32)
    freqs_cis = precompute_freqs_cis(seqlen, args.qk_rope_head_dim, args.rope_theta)
    mask = jnp.triu(jnp.full((seqlen, seqlen), float("-inf"), dtype=jnp.float32), k=1)

    block = Block(0, args, k_blk)

    block_fn = jax.jit(lambda xx: block(xx, start_pos, freqs_cis, mask))
    y = jax.block_until_ready(block_fn(x))
    assert y.shape == (batch, seqlen, args.dim)
    assert bool(jnp.all(jnp.isfinite(y)))

    # Correctness: same math with the Pallas kernels swapped for plain jnp.
    _USE_PALLAS = False
    y_ref = jax.block_until_ready(block(x, start_pos, freqs_cis, mask))
    _USE_PALLAS = True
    assert jnp.allclose(y, y_ref, atol=2e-3, rtol=2e-3), \
        float(jnp.max(jnp.abs(y - y_ref)))

    # Also exercise the split-K accumulator kernel + padding + fused-bias path.
    km1, km2, km3 = jax.random.split(jax.random.PRNGKey(1), 3)
    xk = jax.random.normal(km1, (20, 2500), jnp.float32)
    wk = jax.random.normal(km2, (192, 2500), jnp.float32) * 0.02
    bk = jax.random.normal(km3, (192,), jnp.float32)
    yk = jax.block_until_ready(pallas_linear(xk, jnp.asarray(wk.T), bk))
    yk_ref = xk @ wk.T + bk[None, :]
    assert jnp.allclose(yk, yk_ref, atol=1e-2, rtol=1e-3), \
        float(jnp.max(jnp.abs(yk - yk_ref)))

    print("KERNEL_OK")
</pallas_src>

<mosaic_0001>
module attributes {stable_mosaic.version = 11 : i64} {
  func.func @_rmsnorm_kernel(%arg0: i32, %arg1: memref<16x64xf32, #tpu.memory_space<vmem>>, %arg2: memref<1x64xf32, #tpu.memory_space<vmem>>, %arg3: memref<16x64xf32, #tpu.memory_space<vmem>>) attributes {dimension_semantics = [#tpu.dimension_semantics<parallel>], iteration_bounds = array<i64: 1>, scalar_prefetch = 0 : i64, scratch_operands = 0 : i64, tpu.core_type = #tpu.core_type<tc>, window_params = [{transform_indices = @transform_0, window_bounds = array<i64: 16, 64>}, {pipeline_mode = #tpu.pipeline_mode<synchronous>, transform_indices = @transform_1, window_bounds = array<i64: 1, 64>}, {transform_indices = @transform_2, window_bounds = array<i64: 16, 64>}]} {
    %c0 = arith.constant 0 : index
    %c0_0 = arith.constant 0 : index
    %0 = vector.load %arg1[%c0, %c0_0] : memref<16x64xf32, #tpu.memory_space<vmem>>, vector<16x64xf32>
    %1 = arith.mulf %0, %0 : vector<16x64xf32>
    %cst = arith.constant dense<0.000000e+00> : vector<16xf32>
    %2 = vector.multi_reduction <add>, %1, %cst [1] : vector<16x64xf32> to vector<16xf32>
    %3 = vector.shape_cast %2 : vector<16xf32> to vector<16x1xf32>
    %cst_1 = arith.constant 6.400000e+01 : f32
    %4 = vector.broadcast %cst_1 : f32 to vector<16x1xf32>
    %5 = arith.divf %3, %4 : vector<16x1xf32>
    %cst_2 = arith.constant 9.99999997E-7 : f32
    %6 = vector.broadcast %cst_2 : f32 to vector<16x1xf32>
    %7 = arith.addf %5, %6 : vector<16x1xf32>
    %8 = math.rsqrt %7 : vector<16x1xf32>
    %9 = vector.broadcast %8 : vector<16x1xf32> to vector<16x64xf32>
    %10 = arith.mulf %0, %9 : vector<16x64xf32>
    %c0_3 = arith.constant 0 : index
    %c0_4 = arith.constant 0 : index
    %11 = vector.load %arg2[%c0_3, %c0_4] : memref<1x64xf32, #tpu.memory_space<vmem>>, vector<1x64xf32>
    %12 = vector.broadcast %11 : vector<1x64xf32> to vector<16x64xf32>
    %13 = arith.mulf %10, %12 : vector<16x64xf32>
    %c0_5 = arith.constant 0 : index
    %c0_6 = arith.constant 0 : index
    %14 = vector.load %arg3[%c0_5, %c0_6] : memref<16x64xf32, #tpu.memory_space<vmem>>, vector<16x64xf32>
    tpu.vector_store %arg3[%c0_5, %c0_6], %13 {strides = array<i32>} : memref<16x64xf32, #tpu.memory_space<vmem>>, vector<16x64xf32>,
    return
  }
  func.func @transform_0(%arg0: i32) -> (i32, i32) {
    %c0_i32 = arith.constant 0 : i32
    %c0_i32_0 = arith.constant 0 : i32
    return %arg0, %c0_i32 : i32, i32
  }
  func.func @transform_1(%arg0: i32) -> (i32, i32) {
    %c0_i32 = arith.constant 0 : i32
    %c0_i32_0 = arith.constant 0 : i32
    %c0_i32_1 = arith.constant 0 : i32
    return %c0_i32, %c0_i32_0 : i32, i32
  }
  func.func @transform_2(%arg0: i32) -> (i32, i32) {
    %c0_i32 = arith.constant 0 : i32
    %c0_i32_0 = arith.constant 0 : i32
    return %arg0, %c0_i32 : i32, i32
  }
}

module attributes {stable_mosaic.version = 11 : i64} {
  func.func @_linear_kernel_single(%arg0: i32, %arg1: i32, %arg2: memref<16x64xf32, #tpu.memory_space<vmem>>, %arg3: memref<64x32xf32, #tpu.memory_space<vmem>>, %arg4: memref<1x32xf32, #tpu.memory_space<vmem>>, %arg5: memref<16x32xf32, #tpu.memory_space<vmem>>) attributes {dimension_semantics = [#tpu.dimension_semantics<parallel>, #tpu.dimension_semantics<parallel>], iteration_bounds = array<i64: 1, 1>, scalar_prefetch = 0 : i64, scratch_operands = 0 : i64, tpu.core_type = #tpu.core_type<tc>, window_params = [{transform_indices = @transform_0, window_bounds = array<i64: 16, 64>}, {transform_indices = @transform_1, window_bounds = array<i64: 64, 32>}, {transform_indices = @transform_2, window_bounds = array<i64: 1, 32>}, {transform_indices = @transform_3, window_bounds = array<i64: 16, 32>}]} {
    %c0 = arith.constant 0 : index
    %c0_0 = arith.constant 0 : index
    %0 = vector.load %arg2[%c0, %c0_0] : memref<16x64xf32, #tpu.memory_space<vmem>>, vector<16x64xf32>
    %c0_1 = arith.constant 0 : index
    %c0_2 = arith.constant 0 : index
    %1 = vector.load %arg3[%c0_1, %c0_2] : memref<64x32xf32, #tpu.memory_space<vmem>>, vector<64x32xf32>
    %cst = arith.constant dense<0.000000e+00> : vector<16x32xf32>
    %2 = tpu.matmul %0, %1, %cst {dimension_numbers = #tpu.dot_dimension_numbers<[1], [0], [0], [1], [0, 0, 1, 1], [], []>} : vector<16x64xf32>, vector<64x32xf32>, vector<16x32xf32> -> vector<16x32xf32>
    %c0_3 = arith.constant 0 : index
    %c0_4 = arith.constant 0 : index
    %3 = vector.load %arg4[%c0_3, %c0_4] : memref<1x32xf32, #tpu.memory_space<vmem>>, vector<1x32xf32>
    %4 = vector.broadcast %3 : vector<1x32xf32> to vector<16x32xf32>
    %5 = arith.addf %2, %4 : vector<16x32xf32>
    %c0_5 = arith.constant 0 : index
    %c0_6 = arith.constant 0 : index
    %6 = vector.load %arg5[%c0_5, %c0_6] : memref<16x32xf32, #tpu.memory_space<vmem>>, vector<16x32xf32>
    tpu.vector_store %arg5[%c0_5, %c0_6], %5 {strides = array<i32>} : memref<16x32xf32, #tpu.memory_space<vmem>>, vector<16x32xf32>,
    return
  }
  func.func @transform_0(%arg0: i32, %arg1: i32) -> (i32, i32) {
    %c0_i32 = arith.constant 0 : i32
    %c0_i32_0 = arith.constant 0 : i32
    return %arg0, %c0_i32 : i32, i32
  }
  func.func @transform_1(%arg0: i32, %arg1: i32) -> (i32, i32) {
    %c0_i32 = arith.constant 0 : i32
    %c0_i32_0 = arith.constant 0 : i32
    return %c0_i32, %arg1 : i32, i32
  }
  func.func @transform_2(%arg0: i32, %arg1: i32) -> (i32, i32) {
    %c0_i32 = arith.constant 0 : i32
    %c0_i32_0 = arith.constant 0 : i32
    return %c0_i32, %arg1 : i32, i32
  }
  func.func @transform_3(%arg0: i32, %arg1: i32) -> (i32, i32) {
    %c0_i32 = arith.constant 0 : i32
    return %arg0, %arg1 : i32, i32
  }
}

module attributes {stable_mosaic.version = 11 : i64} {
  func.func @_rmsnorm_kernel(%arg0: i32, %arg1: memref<16x32xf32, #tpu.memory_space<vmem>>, %arg2: memref<1x32xf32, #tpu.memory_space<vmem>>, %arg3: memref<16x32xf32, #tpu.memory_space<vmem>>) attributes {dimension_semantics = [#tpu.dimension_semantics<parallel>], iteration_bounds = array<i64: 1>, scalar_prefetch = 0 : i64, scratch_operands = 0 : i64, tpu.core_type = #tpu.core_type<tc>, window_params = [{transform_indices = @transform_0, window_bounds = array<i64: 16, 32>}, {pipeline_mode = #tpu.pipeline_mode<synchronous>, transform_indices = @transform_1, window_bounds = array<i64: 1, 32>}, {transform_indices = @transform_2, window_bounds = array<i64: 16, 32>}]} {
    %c0 = arith.constant 0 : index
    %c0_0 = arith.constant 0 : index
    %0 = vector.load %arg1[%c0, %c0_0] : memref<16x32xf32, #tpu.memory_space<vmem>>, vector<16x32xf32>
    %1 = arith.mulf %0, %0 : vector<16x32xf32>
    %cst = arith.constant dense<0.000000e+00> : vector<16xf32>
    %2 = vector.multi_reduction <add>, %1, %cst [1] : vector<16x32xf32> to vector<16xf32>
    %3 = vector.shape_cast %2 : vector<16xf32> to vector<16x1xf32>
    %cst_1 = arith.constant 3.200000e+01 : f32
    %4 = vector.broadcast %cst_1 : f32 to vector<16x1xf32>
    %5 = arith.divf %3, %4 : vector<16x1xf32>
    %cst_2 = arith.constant 9.99999997E-7 : f32
    %6 = vector.broadcast %cst_2 : f32 to vector<16x1xf32>
    %7 = arith.addf %5, %6 : vector<16x1xf32>
    %8 = math.rsqrt %7 : vector<16x1xf32>
    %9 = vector.broadcast %8 : vector<16x1xf32> to vector<16x32xf32>
    %10 = arith.mulf %0, %9 : vector<16x32xf32>
    %c0_3 = arith.constant 0 : index
    %c0_4 = arith.constant 0 : index
    %11 = vector.load %arg2[%c0_3, %c0_4] : memref<1x32xf32, #tpu.memory_space<vmem>>, vector<1x32xf32>
    %12 = vector.broadcast %11 : vector<1x32xf32> to vector<16x32xf32>
    %13 = arith.mulf %10, %12 : vector<16x32xf32>
    %c0_5 = arith.constant 0 : index
    %c0_6 = arith.constant 0 : index
    %14 = vector.load %arg3[%c0_5, %c0_6] : memref<16x32xf32, #tpu.memory_space<vmem>>, vector<16x32xf32>
    tpu.vector_store %arg3[%c0_5, %c0_6], %13 {strides = array<i32>} : memref<16x32xf32, #tpu.memory_space<vmem>>, vector<16x32xf32>,
    return
  }
  func.func @transform_0(%arg0: i32) -> (i32, i32) {
    %c0_i32 = arith.constant 0 : i32
    %c0_i32_0 = arith.constant 0 : i32
    return %arg0, %c0_i32 : i32, i32
  }
  func.func @transform_1(%arg0: i32) -> (i32, i32) {
    %c0_i32 = arith.constant 0 : i32
    %c0_i32_0 = arith.constant 0 : i32
    %c0_i32_1 = arith.constant 0 : i32
    return %c0_i32, %c0_i32_0 : i32, i32
  }
  func.func @transform_2(%arg0: i32) -> (i32, i32) {
    %c0_i32 = arith.constant 0 : i32
    %c0_i32_0 = arith.constant 0 : i32
    return %arg0, %c0_i32 : i32, i32
  }
}

module attributes {stable_mosaic.version = 11 : i64} {
  func.func @_linear_kernel_single(%arg0: i32, %arg1: i32, %arg2: memref<16x32xf32, #tpu.memory_space<vmem>>, %arg3: memref<32x48xf32, #tpu.memory_space<vmem>>, %arg4: memref<1x48xf32, #tpu.memory_space<vmem>>, %arg5: memref<16x48xf32, #tpu.memory_space<vmem>>) attributes {dimension_semantics = [#tpu.dimension_semantics<parallel>, #tpu.dimension_semantics<parallel>], iteration_bounds = array<i64: 1, 1>, scalar_prefetch = 0 : i64, scratch_operands = 0 : i64, tpu.core_type = #tpu.core_type<tc>, window_params = [{transform_indices = @transform_0, window_bounds = array<i64: 16, 32>}, {transform_indices = @transform_1, window_bounds = array<i64: 32, 48>}, {transform_indices = @transform_2, window_bounds = array<i64: 1, 48>}, {transform_indices = @transform_3, window_bounds = array<i64: 16, 48>}]} {
    %c0 = arith.constant 0 : index
    %c0_0 = arith.constant 0 : index
    %0 = vector.load %arg2[%c0, %c0_0] : memref<16x32xf32, #tpu.memory_space<vmem>>, vector<16x32xf32>
    %c0_1 = arith.constant 0 : index
    %c0_2 = arith.constant 0 : index
    %1 = vector.load %arg3[%c0_1, %c0_2] : memref<32x48xf32, #tpu.memory_space<vmem>>, vector<32x48xf32>
    %cst = arith.constant dense<0.000000e+00> : vector<16x48xf32>
    %2 = tpu.matmul %0, %1, %cst {dimension_numbers = #tpu.dot_dimension_numbers<[1], [0], [0], [1], [0, 0, 1, 1], [], []>} : vector<16x32xf32>, vector<32x48xf32>, vector<16x48xf32> -> vector<16x48xf32>
    %c0_3 = arith.constant 0 : index
    %c0_4 = arith.constant 0 : index
    %3 = vector.load %arg4[%c0_3, %c0_4] : memref<1x48xf32, #tpu.memory_space<vmem>>, vector<1x48xf32>
    %4 = vector.broadcast %3 : vector<1x48xf32> to vector<16x48xf32>
    %5 = arith.addf %2, %4 : vector<16x48xf32>
    %c0_5 = arith.constant 0 : index
    %c0_6 = arith.constant 0 : index
    %6 = vector.load %arg5[%c0_5, %c0_6] : memref<16x48xf32, #tpu.memory_space<vmem>>, vector<16x48xf32>
    tpu.vector_store %arg5[%c0_5, %c0_6], %5 {strides = array<i32>} : memref<16x48xf32, #tpu.memory_space<vmem>>, vector<16x48xf32>,
    return
  }
  func.func @transform_0(%arg0: i32, %arg1: i32) -> (i32, i32) {
    %c0_i32 = arith.constant 0 : i32
    %c0_i32_0 = arith.constant 0 : i32
    return %arg0, %c0_i32 : i32, i32
  }
  func.func @transform_1(%arg0: i32, %arg1: i32) -> (i32, i32) {
    %c0_i32 = arith.constant 0 : i32
    %c0_i32_0 = arith.constant 0 : i32
    return %c0_i32, %arg1 : i32, i32
  }
  func.func @transform_2(%arg0: i32, %arg1: i32) -> (i32, i32) {
    %c0_i32 = arith.constant 0 : i32
    %c0_i32_0 = arith.constant 0 : i32
    return %c0_i32, %arg1 : i32, i32
  }
  func.func @transform_3(%arg0: i32, %arg1: i32) -> (i32, i32) {
    %c0_i32 = arith.constant 0 : i32
    return %arg0, %arg1 : i32, i32
  }
}

module attributes {stable_mosaic.version = 11 : i64} {
  func.func @_linear_kernel_single(%arg0: i32, %arg1: i32, %arg2: memref<16x64xf32, #tpu.memory_space<vmem>>, %arg3: memref<64x40xf32, #tpu.memory_space<vmem>>, %arg4: memref<1x40xf32, #tpu.memory_space<vmem>>, %arg5: memref<16x40xf32, #tpu.memory_space<vmem>>) attributes {dimension_semantics = [#tpu.dimension_semantics<parallel>, #tpu.dimension_semantics<parallel>], iteration_bounds = array<i64: 1, 1>, scalar_prefetch = 0 : i64, scratch_operands = 0 : i64, tpu.core_type = #tpu.core_type<tc>, window_params = [{transform_indices = @transform_0, window_bounds = array<i64: 16, 64>}, {transform_indices = @transform_1, window_bounds = array<i64: 64, 40>}, {transform_indices = @transform_2, window_bounds = array<i64: 1, 40>}, {transform_indices = @transform_3, window_bounds = array<i64: 16, 40>}]} {
    %c0 = arith.constant 0 : index
    %c0_0 = arith.constant 0 : index
    %0 = vector.load %arg2[%c0, %c0_0] : memref<16x64xf32, #tpu.memory_space<vmem>>, vector<16x64xf32>
    %c0_1 = arith.constant 0 : index
    %c0_2 = arith.constant 0 : index
    %1 = vector.load %arg3[%c0_1, %c0_2] : memref<64x40xf32, #tpu.memory_space<vmem>>, vector<64x40xf32>
    %cst = arith.constant dense<0.000000e+00> : vector<16x40xf32>
    %2 = tpu.matmul %0, %1, %cst {dimension_numbers = #tpu.dot_dimension_numbers<[1], [0], [0], [1], [0, 0, 1, 1], [], []>} : vector<16x64xf32>, vector<64x40xf32>, vector<16x40xf32> -> vector<16x40xf32>
    %c0_3 = arith.constant 0 : index
    %c0_4 = arith.constant 0 : index
    %3 = vector.load %arg4[%c0_3, %c0_4] : memref<1x40xf32, #tpu.memory_space<vmem>>, vector<1x40xf32>
    %4 = vector.broadcast %3 : vector<1x40xf32> to vector<16x40xf32>
    %5 = arith.addf %2, %4 : vector<16x40xf32>
    %c0_5 = arith.constant 0 : index
    %c0_6 = arith.constant 0 : index
    %6 = vector.load %arg5[%c0_5, %c0_6] : memref<16x40xf32, #tpu.memory_space<vmem>>, vector<16x40xf32>
    tpu.vector_store %arg5[%c0_5, %c0_6], %5 {strides = array<i32>} : memref<16x40xf32, #tpu.memory_space<vmem>>, vector<16x40xf32>,
    return
  }
  func.func @transform_0(%arg0: i32, %arg1: i32) -> (i32, i32) {
    %c0_i32 = arith.constant 0 : i32
    %c0_i32_0 = arith.constant 0 : i32
    return %arg0, %c0_i32 : i32, i32
  }
  func.func @transform_1(%arg0: i32, %arg1: i32) -> (i32, i32) {
    %c0_i32 = arith.constant 0 : i32
    %c0_i32_0 = arith.constant 0 : i32
    return %c0_i32, %arg1 : i32, i32
  }
  func.func @transform_2(%arg0: i32, %arg1: i32) -> (i32, i32) {
    %c0_i32 = arith.constant 0 : i32
    %c0_i32_0 = arith.constant 0 : i32
    return %c0_i32, %arg1 : i32, i32
  }
  func.func @transform_3(%arg0: i32, %arg1: i32) -> (i32, i32) {
    %c0_i32 = arith.constant 0 : i32
    return %arg0, %arg1 : i32, i32
  }
}

module attributes {stable_mosaic.version = 11 : i64} {
  func.func @_linear_kernel_single(%arg0: i32, %arg1: i32, %arg2: memref<16x32xf32, #tpu.memory_space<vmem>>, %arg3: memref<32x64xf32, #tpu.memory_space<vmem>>, %arg4: memref<1x64xf32, #tpu.memory_space<vmem>>, %arg5: memref<16x64xf32, #tpu.memory_space<vmem>>) attributes {dimension_semantics = [#tpu.dimension_semantics<parallel>, #tpu.dimension_semantics<parallel>], iteration_bounds = array<i64: 1, 1>, scalar_prefetch = 0 : i64, scratch_operands = 0 : i64, tpu.core_type = #tpu.core_type<tc>, window_params = [{transform_indices = @transform_0, window_bounds = array<i64: 16, 32>}, {transform_indices = @transform_1, window_bounds = array<i64: 32, 64>}, {transform_indices = @transform_2, window_bounds = array<i64: 1, 64>}, {transform_indices = @transform_3, window_bounds = array<i64: 16, 64>}]} {
    %c0 = arith.constant 0 : index
    %c0_0 = arith.constant 0 : index
    %0 = vector.load %arg2[%c0, %c0_0] : memref<16x32xf32, #tpu.memory_space<vmem>>, vector<16x32xf32>
    %c0_1 = arith.constant 0 : index
    %c0_2 = arith.constant 0 : index
    %1 = vector.load %arg3[%c0_1, %c0_2] : memref<32x64xf32, #tpu.memory_space<vmem>>, vector<32x64xf32>
    %cst = arith.constant dense<0.000000e+00> : vector<16x64xf32>
    %2 = tpu.matmul %0, %1, %cst {dimension_numbers = #tpu.dot_dimension_numbers<[1], [0], [0], [1], [0, 0, 1, 1], [], []>} : vector<16x32xf32>, vector<32x64xf32>, vector<16x64xf32> -> vector<16x64xf32>
    %c0_3 = arith.constant 0 : index
    %c0_4 = arith.constant 0 : index
    %3 = vector.load %arg4[%c0_3, %c0_4] : memref<1x64xf32, #tpu.memory_space<vmem>>, vector<1x64xf32>
    %4 = vector.broadcast %3 : vector<1x64xf32> to vector<16x64xf32>
    %5 = arith.addf %2, %4 : vector<16x64xf32>
    %c0_5 = arith.constant 0 : index
    %c0_6 = arith.constant 0 : index
    %6 = vector.load %arg5[%c0_5, %c0_6] : memref<16x64xf32, #tpu.memory_space<vmem>>, vector<16x64xf32>
    tpu.vector_store %arg5[%c0_5, %c0_6], %5 {strides = array<i32>} : memref<16x64xf32, #tpu.memory_space<vmem>>, vector<16x64xf32>,
    return
  }
  func.func @transform_0(%arg0: i32, %arg1: i32) -> (i32, i32) {
    %c0_i32 = arith.constant 0 : i32
    %c0_i32_0 = arith.constant 0 : i32
    return %arg0, %c0_i32 : i32, i32
  }
  func.func @transform_1(%arg0: i32, %arg1: i32) -> (i32, i32) {
    %c0_i32 = arith.constant 0 : i32
    %c0_i32_0 = arith.constant 0 : i32
    return %c0_i32, %arg1 : i32, i32
  }
  func.func @transform_2(%arg0: i32, %arg1: i32) -> (i32, i32) {
    %c0_i32 = arith.constant 0 : i32
    %c0_i32_0 = arith.constant 0 : i32
    return %c0_i32, %arg1 : i32, i32
  }
  func.func @transform_3(%arg0: i32, %arg1: i32) -> (i32, i32) {
    %c0_i32 = arith.constant 0 : i32
    return %arg0, %arg1 : i32, i32
  }
}

module attributes {stable_mosaic.version = 11 : i64} {
  func.func @_rmsnorm_kernel(%arg0: i32, %arg1: memref<16x64xf32, #tpu.memory_space<vmem>>, %arg2: memref<1x64xf32, #tpu.memory_space<vmem>>, %arg3: memref<16x64xf32, #tpu.memory_space<vmem>>) attributes {dimension_semantics = [#tpu.dimension_semantics<parallel>], iteration_bounds = array<i64: 1>, scalar_prefetch = 0 : i64, scratch_operands = 0 : i64, tpu.core_type = #tpu.core_type<tc>, window_params = [{transform_indices = @transform_0, window_bounds = array<i64: 16, 64>}, {pipeline_mode = #tpu.pipeline_mode<synchronous>, transform_indices = @transform_1, window_bounds = array<i64: 1, 64>}, {transform_indices = @transform_2, window_bounds = array<i64: 16, 64>}]} {
    %c0 = arith.constant 0 : index
    %c0_0 = arith.constant 0 : index
    %0 = vector.load %arg1[%c0, %c0_0] : memref<16x64xf32, #tpu.memory_space<vmem>>, vector<16x64xf32>
    %1 = arith.mulf %0, %0 : vector<16x64xf32>
    %cst = arith.constant dense<0.000000e+00> : vector<16xf32>
    %2 = vector.multi_reduction <add>, %1, %cst [1] : vector<16x64xf32> to vector<16xf32>
    %3 = vector.shape_cast %2 : vector<16xf32> to vector<16x1xf32>
    %cst_1 = arith.constant 6.400000e+01 : f32
    %4 = vector.broadcast %cst_1 : f32 to vector<16x1xf32>
    %5 = arith.divf %3, %4 : vector<16x1xf32>
    %cst_2 = arith.constant 9.99999997E-7 : f32
    %6 = vector.broadcast %cst_2 : f32 to vector<16x1xf32>
    %7 = arith.addf %5, %6 : vector<16x1xf32>
    %8 = math.rsqrt %7 : vector<16x1xf32>
    %9 = vector.broadcast %8 : vector<16x1xf32> to vector<16x64xf32>
    %10 = arith.mulf %0, %9 : vector<16x64xf32>
    %c0_3 = arith.constant 0 : index
    %c0_4 = arith.constant 0 : index
    %11 = vector.load %arg2[%c0_3, %c0_4] : memref<1x64xf32, #tpu.memory_space<vmem>>, vector<1x64xf32>
    %12 = vector.broadcast %11 : vector<1x64xf32> to vector<16x64xf32>
    %13 = arith.mulf %10, %12 : vector<16x64xf32>
    %c0_5 = arith.constant 0 : index
    %c0_6 = arith.constant 0 : index
    %14 = vector.load %arg3[%c0_5, %c0_6] : memref<16x64xf32, #tpu.memory_space<vmem>>, vector<16x64xf32>
    tpu.vector_store %arg3[%c0_5, %c0_6], %13 {strides = array<i32>} : memref<16x64xf32, #tpu.memory_space<vmem>>, vector<16x64xf32>,
    return
  }
  func.func @transform_0(%arg0: i32) -> (i32, i32) {
    %c0_i32 = arith.constant 0 : i32
    %c0_i32_0 = arith.constant 0 : i32
    return %arg0, %c0_i32 : i32, i32
  }
  func.func @transform_1(%arg0: i32) -> (i32, i32) {
    %c0_i32 = arith.constant 0 : i32
    %c0_i32_0 = arith.constant 0 : i32
    %c0_i32_1 = arith.constant 0 : i32
    return %c0_i32, %c0_i32_0 : i32, i32
  }
  func.func @transform_2(%arg0: i32) -> (i32, i32) {
    %c0_i32 = arith.constant 0 : i32
    %c0_i32_0 = arith.constant 0 : i32
    return %arg0, %c0_i32 : i32, i32
  }
}

module attributes {stable_mosaic.version = 11 : i64} {
  func.func @_linear_kernel_single(%arg0: i32, %arg1: i32, %arg2: memref<16x64xf32, #tpu.memory_space<vmem>>, %arg3: memref<64x128xf32, #tpu.memory_space<vmem>>, %arg4: memref<1x128xf32, #tpu.memory_space<vmem>>, %arg5: memref<16x128xf32, #tpu.memory_space<vmem>>) attributes {dimension_semantics = [#tpu.dimension_semantics<parallel>, #tpu.dimension_semantics<parallel>], iteration_bounds = array<i64: 1, 1>, scalar_prefetch = 0 : i64, scratch_operands = 0 : i64, tpu.core_type = #tpu.core_type<tc>, window_params = [{transform_indices = @transform_0, window_bounds = array<i64: 16, 64>}, {transform_indices = @transform_1, window_bounds = array<i64: 64, 128>}, {transform_indices = @transform_2, window_bounds = array<i64: 1, 128>}, {transform_indices = @transform_3, window_bounds = array<i64: 16, 128>}]} {
    %c0 = arith.constant 0 : index
    %c0_0 = arith.constant 0 : index
    %0 = vector.load %arg2[%c0, %c0_0] : memref<16x64xf32, #tpu.memory_space<vmem>>, vector<16x64xf32>
    %c0_1 = arith.constant 0 : index
    %c0_2 = arith.constant 0 : index
    %1 = vector.load %arg3[%c0_1, %c0_2] : memref<64x128xf32, #tpu.memory_space<vmem>>, vector<64x128xf32>
    %cst = arith.constant dense<0.000000e+00> : vector<16x128xf32>
    %2 = tpu.matmul %0, %1, %cst {dimension_numbers = #tpu.dot_dimension_numbers<[1], [0], [0], [1], [0, 0, 1, 1], [], []>} : vector<16x64xf32>, vector<64x128xf32>, vector<16x128xf32> -> vector<16x128xf32>
    %c0_3 = arith.constant 0 : index
    %c0_4 = arith.constant 0 : index
    %3 = vector.load %arg4[%c0_3, %c0_4] : memref<1x128xf32, #tpu.memory_space<vmem>>, vector<1x128xf32>
    %4 = vector.broadcast %3 : vector<1x128xf32> to vector<16x128xf32>
    %5 = arith.addf %2, %4 : vector<16x128xf32>
    %c0_5 = arith.constant 0 : index
    %c0_6 = arith.constant 0 : index
    %6 = vector.load %arg5[%c0_5, %c0_6] : memref<16x128xf32, #tpu.memory_space<vmem>>, vector<16x128xf32>
    tpu.vector_store %arg5[%c0_5, %c0_6], %5 {strides = array<i32>} : memref<16x128xf32, #tpu.memory_space<vmem>>, vector<16x128xf32>,
    return
  }
  func.func @transform_0(%arg0: i32, %arg1: i32) -> (i32, i32) {
    %c0_i32 = arith.constant 0 : i32
    %c0_i32_0 = arith.constant 0 : i32
    return %arg0, %c0_i32 : i32, i32
  }
  func.func @transform_1(%arg0: i32, %arg1: i32) -> (i32, i32) {
    %c0_i32 = arith.constant 0 : i32
    %c0_i32_0 = arith.constant 0 : i32
    return %c0_i32, %arg1 : i32, i32
  }
  func.func @transform_2(%arg0: i32, %arg1: i32) -> (i32, i32) {
    %c0_i32 = arith.constant 0 : i32
    %c0_i32_0 = arith.constant 0 : i32
    return %c0_i32, %arg1 : i32, i32
  }
  func.func @transform_3(%arg0: i32, %arg1: i32) -> (i32, i32) {
    %c0_i32 = arith.constant 0 : i32
    return %arg0, %arg1 : i32, i32
  }
}

module attributes {stable_mosaic.version = 11 : i64} {
  func.func @_linear_kernel_single(%arg0: i32, %arg1: i32, %arg2: memref<16x128xf32, #tpu.memory_space<vmem>>, %arg3: memref<128x64xf32, #tpu.memory_space<vmem>>, %arg4: memref<1x64xf32, #tpu.memory_space<vmem>>, %arg5: memref<16x64xf32, #tpu.memory_space<vmem>>) attributes {dimension_semantics = [#tpu.dimension_semantics<parallel>, #tpu.dimension_semantics<parallel>], iteration_bounds = array<i64: 1, 1>, scalar_prefetch = 0 : i64, scratch_operands = 0 : i64, tpu.core_type = #tpu.core_type<tc>, window_params = [{transform_indices = @transform_0, window_bounds = array<i64: 16, 128>}, {transform_indices = @transform_1, window_bounds = array<i64: 128, 64>}, {transform_indices = @transform_2, window_bounds = array<i64: 1, 64>}, {transform_indices = @transform_3, window_bounds = array<i64: 16, 64>}]} {
    %c0 = arith.constant 0 : index
    %c0_0 = arith.constant 0 : index
    %0 = vector.load %arg2[%c0, %c0_0] : memref<16x128xf32, #tpu.memory_space<vmem>>, vector<16x128xf32>
    %c0_1 = arith.constant 0 : index
    %c0_2 = arith.constant 0 : index
    %1 = vector.load %arg3[%c0_1, %c0_2] : memref<128x64xf32, #tpu.memory_space<vmem>>, vector<128x64xf32>
    %cst = arith.constant dense<0.000000e+00> : vector<16x64xf32>
    %2 = tpu.matmul %0, %1, %cst {dimension_numbers = #tpu.dot_dimension_numbers<[1], [0], [0], [1], [0, 0, 1, 1], [], []>} : vector<16x128xf32>, vector<128x64xf32>, vector<16x64xf32> -> vector<16x64xf32>
    %c0_3 = arith.constant 0 : index
    %c0_4 = arith.constant 0 : index
    %3 = vector.load %arg4[%c0_3, %c0_4] : memref<1x64xf32, #tpu.memory_space<vmem>>, vector<1x64xf32>
    %4 = vector.broadcast %3 : vector<1x64xf32> to vector<16x64xf32>
    %5 = arith.addf %2, %4 : vector<16x64xf32>
    %c0_5 = arith.constant 0 : index
    %c0_6 = arith.constant 0 : index
    %6 = vector.load %arg5[%c0_5, %c0_6] : memref<16x64xf32, #tpu.memory_space<vmem>>, vector<16x64xf32>
    tpu.vector_store %arg5[%c0_5, %c0_6], %5 {strides = array<i32>} : memref<16x64xf32, #tpu.memory_space<vmem>>, vector<16x64xf32>,
    return
  }
  func.func @transform_0(%arg0: i32, %arg1: i32) -> (i32, i32) {
    %c0_i32 = arith.constant 0 : i32
    %c0_i32_0 = arith.constant 0 : i32
    return %arg0, %c0_i32 : i32, i32
  }
  func.func @transform_1(%arg0: i32, %arg1: i32) -> (i32, i32) {
    %c0_i32 = arith.constant 0 : i32
    %c0_i32_0 = arith.constant 0 : i32
    return %c0_i32, %arg1 : i32, i32
  }
  func.func @transform_2(%arg0: i32, %arg1: i32) -> (i32, i32) {
    %c0_i32 = arith.constant 0 : i32
    %c0_i32_0 = arith.constant 0 : i32
    return %c0_i32, %arg1 : i32, i32
  }
  func.func @transform_3(%arg0: i32, %arg1: i32) -> (i32, i32) {
    %c0_i32 = arith.constant 0 : i32
    return %arg0, %arg1 : i32, i32
  }
}

</mosaic_0001>

<bundles_post_ra>
// kernel: _lambda_.16
= control target key start
LH: loop header
LB: loop body
LE: loop exit
PB: predicated region body
PF: predicated region fallthrough
CT: control target
= control target key end

     0   :  { %vm31_vm0 = vcmask 523264   ;;  %vm113_vm1 = vcmask 261120   ;;  %s229_s1 = inlined_call_operand.vmem [shape: f32[64,32], index: 1, kind: input, shape index: {}]   ;;  %s230_s0 = inlined_call_operand.vmem [shape: f32[16,64], index: 0, kind: input, shape index: {}]   ;;  %s231_s2 = inlined_call_operand.vmem [shape: f32[1,32], index: 2, kind: input, shape index: {}]   ;;  %s232_s3 = inlined_call_operand.vmem [shape: f32[16,32], index: 3, kind: output, shape index: {}]  }
   0x1   :  { %v16_v0 = vld [vmem:[%s229_s1] sm:$0xff]  ;;  %v17_v1 = vld [vmem:[%s229_s1 + $0x8] sm:$0xff]  ;;  %v18_v2 = vld [vmem:[%s229_s1 + $0x10] sm:$0xff] }
   0x2   :  { %v152_v3 = vpack.c.bf16 %v17_v1, %v16_v0  ;;  %v19_v4 = vld [vmem:[%s229_s1 + $0x18] sm:$0xff]  ;;  %v20_v6 = vld [vmem:[%s229_s1 + $0x20] sm:$0xff]  ;;  %v21_v7 = vld [vmem:[%s229_s1 + $0x28] sm:$0xff] }
   0x3   :  { %v156_v5 = vpack.c.bf16 %v19_v4, %v18_v2  ;;  %v14_v8 = vld [vmem:[%s230_s0] sm:$0xff]  ;;  %v160_v9 = vpack.c.bf16 %v21_v7, %v20_v6  ;;  %v22_v10 = vld [vmem:[%s229_s1 + $0x30] sm:$0xff]  ;;  %v23_v11 = vld [vmem:[%s229_s1 + $0x38] sm:$0xff] }
   0x4   :  { %153 = vmatprep.subr.bf16.mxu0 %v152_v3  ;;  %149 = vmatprep.mubr.msk.f32.mxu0 %vm31_vm0, %v14_v8  ;;  %v164_v12 = vpack.c.bf16 %v23_v11, %v22_v10  ;;  %v15_v13 = vld [vmem:[%s230_s0 + $0x8] sm:$0xff]  ;;  %v120_v14 = vld [vmem:[%s231_s2] ss:$0 sm:$0xff] }
   0x5   :  { %155 = vmatpush3.bf16.msra.mxu0 %v152_v3 }
   0x6   :  { %157 = vmatprep.subr.bf16.mxu0 %v156_v5 }
   0x9   :  { %159 = vmatpush3.bf16.msra.mxu0 %v156_v5 }
   0xa   :  { %161 = vmatprep.subr.bf16.mxu0 %v160_v9 }
   0xd   :  { %163 = vmatpush3.bf16.msra.mxu0 %v160_v9 }
   0xe   :  { %165 = vmatprep.subr.bf16.mxu0 %v164_v12 }
  0x11   :  { %167 = vmatpush3.bf16.msra.mxu0 %v164_v12 }
  0x14   :  { %150 = vmatmul.mubr.msk.f32.vlgmr.msra.gmra.mrb[0].mxu0 %vm31_vm0, %v15_v13 }
  0xe7   :  { %v151_v15 = vpop.f32.mrb[0].mxu0 }
  0xe8   :  { %v110_v16 = vadd.f32 %v151_v15, %v120_v14  ;;  %v104_v17 = vpop.f32.mrb[1].mxu0 }
  0xe9   :  { %v105_v18 = vadd.f32 %v120_v14, %v104_v17 }
  0xea   :  { %115 = vst.msk [vmem:[%s232_s3 + $0x8] sm:$0xff] %vm113_vm1, %v110_v16 }
  0xeb   :  { %114 = vst.msk [vmem:[%s232_s3] sm:$0xff] %vm113_vm1, %v105_v18 }

// kernel: _lambda_.12
= control target key start
LH: loop header
LB: loop body
LE: loop exit
PB: predicated region body
PF: predicated region fallthrough
CT: control target
= control target key end

     0   :  { %7 = vsyncpa [#allocation3], 0  ;;  %s93_s9 = smov [#allocation2]   ;;  %s136_s0 = inlined_call_operand.hbm [shape: f32[16,64], index: 0, kind: input, shape index: {}]   ;;  %s137_s1 = inlined_call_operand.vmem [shape: f32[1,64], index: 1, kind: input, shape index: {}]   ;;  %s138_s2 = inlined_call_operand.vmem [shape: f32[16,64], index: 2, kind: output, shape index: {}]  }
   0x1   :  { %s13_s10 = sshll.u32 %s93_s9, 4  ;;  %s69_s13 = scalar_lea.hbm %s136_s0, 256  ;;  %s14_s10 = int_to_ptr.vmem [resolvable:$true] %s13_s10 }
   0x2   :  { %p70_p0 = scmp.ne.s32.totalorder %s136_s0, %s69_s13  ;;  %p73_p1 = scmp.lt.u32.totalorder %s69_s13, %s136_s0 }
   0x4   :  { %p75_p2 = pnand %p73_p1, %p70_p0 }
   0x6   :  { %78 = shalt.err (!%p75_p2)
}
   0x7   :  { %s79_s18 = scalar_lea.vmem %s14_s10, 256  ;;  %p84_p4 = scmp.lt.s32.totalorder %s14_s10, %s14_s10 }
   0x8   :  { %p80_p3 = scmp.ne.s32.totalorder %s14_s10, %s79_s18  ;;  %p85_p5 = scmp.lt.s32.totalorder %s79_s18, %s79_s18 }
   0xa   :  { %p86_p6 = por %p85_p5, %p84_p4 }
   0xc   :  { %p87_p7 = pnand %p86_p6, %p80_p3 }
   0xe   :  { %90 = shalt.err (!%p87_p7)
}
   0xf   :  { %s94_s19 = smov 128   ;;  %s95_s20 = smov 8  }
  0x10   :  { %19 = dma.hbm_to_vmem [thread:$0]  %s136_s0, 256, %s14_s10, [#allocation3], %s94_s19, %s94_s19, %s95_s20  }
  0x11   :  { %91 = dma.done.wait [#allocation3], 256  }
  0x12   :  { %92 = vsyncadd [#allocation3], 4294967040  ;;  %v25_v0 = vld [vmem:[#allocation2] sm:$0xff]  ;;  %vm29_vm0 = vcmask 523264   ;;  %v26_v1 = vld [vmem:[#allocation2 + $0x8] sm:$0xff] }
  0x13   :  { %v27_v2 = vmul.f32 %v25_v0, %v25_v0  ;;  %v28_v3 = vmul.f32 %v26_v1, %v26_v1  ;;  %v61_v13 = vld [vmem:[%s137_s1] ss:$0 sm:$0xff] }
  0x15   :  { %v30_v4 = vsel %vm29_vm0, %v27_v2, 0.0  ;;  %v33_v5 = vsel %vm29_vm0, %v28_v3, 0.0 }
  0x16   :  { %31 = vadd.xlane.f32.xlu0 %v30_v4 }
  0x1a   :  { %34 = vadd.xlane.f32.xlu0 %v33_v5 }
  0xa3   :  { %v32_v6 = vpop.xlane.xlu0 %31 }
  0xa4   :  { %v37_v7 = vmul.f32 0.015625, %v32_v6 }
  0xa6   :  { %v39_v8 = vadd.f32 1e-06, %v37_v7 }
  0xa7   :  { %v35_v9 = vpop.xlane.xlu0 %34 }
  0xa8   :  { %65 = vrsqrt.f32 %v39_v8  ;;  %v38_v10 = vmul.f32 0.015625, %v35_v9 }
  0xaa   :  { %v40_v11 = vadd.f32 1e-06, %v38_v10 }
  0xac   :  { %67 = vrsqrt.f32 %v40_v11 }
  0xb2   :  { %v66_v12 = vpop.eup %65 }
  0xb3   :  { %v43_v14 = vmul.f32 %v66_v12, %v25_v0 }
  0xb5   :  { %v52_v15 = vmul.f32 %v61_v13, %v43_v14 }
  0xb6   :  { %v68_v16 = vpop.eup %67 }
  0xb7   :  { %54 = vst.msk [vmem:[%s138_s2] sm:$0xff] %vm29_vm0, %v52_v15  ;;  %v44_v17 = vmul.f32 %v68_v16, %v26_v1 }
  0xb9   :  { %v53_v18 = vmul.f32 %v61_v13, %v44_v17 }
  0xbb   :  { %55 = vst.msk [vmem:[%s138_s2 + $0x8] sm:$0xff] %vm29_vm0, %v53_v18 }
  0xbc   :  { %60 = vsyncpa [#allocation3], 1 }

// kernel: _lambda_.17
= control target key start
LH: loop header
LB: loop body
LE: loop exit
PB: predicated region body
PF: predicated region fallthrough
CT: control target
= control target key end

     0   :  { %vm15_vm0 = vcmask 261120   ;;  %s85_s0 = inlined_call_operand.vmem [shape: f32[16,32], index: 0, kind: input, shape index: {}]   ;;  %s86_s1 = inlined_call_operand.vmem [shape: f32[1,32], index: 1, kind: input, shape index: {}]   ;;  %s87_s2 = inlined_call_operand.vmem [shape: f32[16,32], index: 2, kind: output, shape index: {}]  }
   0x1   :  { %v11_v0 = vld [vmem:[%s85_s0] sm:$0xff]  ;;  %v12_v1 = vld [vmem:[%s85_s0 + $0x8] sm:$0xff] }
   0x2   :  { %v13_v2 = vmul.f32 %v11_v0, %v11_v0  ;;  %v14_v3 = vmul.f32 %v12_v1, %v12_v1  ;;  %v46_v13 = vld [vmem:[%s86_s1] ss:$0 sm:$0xff] }
   0x4   :  { %v16_v4 = vsel %vm15_vm0, %v13_v2, 0.0  ;;  %v19_v5 = vsel %vm15_vm0, %v14_v3, 0.0 }
   0x5   :  { %17 = vadd.xlane.f32.xlu0 %v16_v4 }
   0x9   :  { %20 = vadd.xlane.f32.xlu0 %v19_v5 }
  0x92   :  { %v18_v6 = vpop.xlane.xlu0 %17 }
  0x93   :  { %v23_v7 = vmul.f32 0.03125, %v18_v6 }
  0x95   :  { %v25_v8 = vadd.f32 1e-06, %v23_v7 }
  0x96   :  { %v21_v9 = vpop.xlane.xlu0 %20 }
  0x97   :  { %47 = vrsqrt.f32 %v25_v8  ;;  %v24_v10 = vmul.f32 0.03125, %v21_v9 }
  0x99   :  { %v26_v11 = vadd.f32 1e-06, %v24_v10 }
  0x9b   :  { %49 = vrsqrt.f32 %v26_v11 }
  0xa1   :  { %v48_v12 = vpop.eup %47 }
  0xa2   :  { %v29_v14 = vmul.f32 %v48_v12, %v11_v0 }
  0xa4   :  { %v38_v15 = vmul.f32 %v46_v13, %v29_v14 }
  0xa5   :  { %v50_v16 = vpop.eup %49 }
  0xa6   :  { %40 = vst.msk [vmem:[%s87_s2] sm:$0xff] %vm15_vm0, %v38_v15  ;;  %v30_v17 = vmul.f32 %v50_v16, %v12_v1 }
  0xa8   :  { %v39_v18 = vmul.f32 %v46_v13, %v30_v17 }
  0xaa   :  { %41 = vst.msk [vmem:[%s87_s2 + $0x8] sm:$0xff] %vm15_vm0, %v39_v18 }

// kernel: _lambda_.18
= control target key start
LH: loop header
LB: loop body
LE: loop exit
PB: predicated region body
PF: predicated region fallthrough
CT: control target
= control target key end

     0   :  { %vm27_vm0 = vcmask 261120   ;;  %vm109_vm1 = vcmask 392192   ;;  %s191_s1 = inlined_call_operand.vmem [shape: f32[32,48], index: 1, kind: input, shape index: {}]   ;;  %s192_s0 = inlined_call_operand.vmem [shape: f32[16,32], index: 0, kind: input, shape index: {}]   ;;  %s193_s2 = inlined_call_operand.vmem [shape: f32[1,48], index: 2, kind: input, shape index: {}]   ;;  %s194_s3 = inlined_call_operand.vmem [shape: f32[16,48], index: 3, kind: output, shape index: {}]  }
   0x1   :  { %v16_v0 = vld [vmem:[%s191_s1] sm:$0xff]  ;;  %v17_v1 = vld [vmem:[%s191_s1 + $0x8] sm:$0xff]  ;;  %v18_v2 = vld [vmem:[%s191_s1 + $0x10] sm:$0xff] }
   0x2   :  { %v136_v3 = vpack.c.bf16 %v17_v1, %v16_v0  ;;  %v19_v4 = vld [vmem:[%s191_s1 + $0x18] sm:$0xff]  ;;  %v14_v5 = vld [vmem:[%s192_s0] sm:$0xff]  ;;  %v15_v7 = vld [vmem:[%s192_s0 + $0x8] sm:$0xff] }
   0x3   :  { %v140_v6 = vpack.c.bf16 %v19_v4, %v18_v2  ;;  %133 = vmatprep.mubr.msk.f32.mxu0 %vm27_vm0, %v14_v5  ;;  %v116_v8 = vld [vmem:[%s193_s2] ss:$0 sm:$0xff] }
   0x4   :  { %137 = vmatprep.subr.bf16.mxu0 %v136_v3 }
   0x5   :  { %139 = vmatpush3.bf16.msra.mxu0 %v136_v3 }
   0x6   :  { %141 = vmatprep.subr.bf16.mxu0 %v140_v6 }
   0x9   :  { %143 = vmatpush3.bf16.msra.mxu0 %v140_v6 }
   0xc   :  { %134 = vmatmul.mubr.msk.f32.vlgmr.msra.gmra.mrb[0].mxu0 %vm27_vm0, %v15_v7 }
  0xdf   :  { %v135_v9 = vpop.f32.mrb[0].mxu0 }
  0xe0   :  { %v106_v10 = vadd.f32 %v135_v9, %v116_v8  ;;  %v100_v11 = vpop.f32.mrb[1].mxu0 }
  0xe1   :  { %v101_v12 = vadd.f32 %v116_v8, %v100_v11 }
  0xe2   :  { %111 = vst.msk [vmem:[%s194_s3 + $0x8] sm:$0xff] %vm109_vm1, %v106_v10 }
  0xe3   :  { %110 = vst.msk [vmem:[%s194_s3] sm:$0xff] %vm109_vm1, %v101_v12 }

// kernel: _lambda_.13
= control target key start
LH: loop header
LB: loop body
LE: loop exit
PB: predicated region body
PF: predicated region fallthrough
CT: control target
= control target key end

     0   :  { %vm31_vm0 = vcmask 523264   ;;  %vm113_vm1 = vcmask 326656   ;;  %s229_s1 = inlined_call_operand.vmem [shape: f32[64,40], index: 1, kind: input, shape index: {}]   ;;  %s230_s0 = inlined_call_operand.vmem [shape: f32[16,64], index: 0, kind: input, shape index: {}]   ;;  %s231_s2 = inlined_call_operand.vmem [shape: f32[1,40], index: 2, kind: input, shape index: {}]   ;;  %s232_s3 = inlined_call_operand.vmem [shape: f32[16,40], index: 3, kind: output, shape index: {}]  }
   0x1   :  { %v16_v0 = vld [vmem:[%s229_s1] sm:$0xff]  ;;  %v17_v1 = vld [vmem:[%s229_s1 + $0x8] sm:$0xff]  ;;  %v18_v2 = vld [vmem:[%s229_s1 + $0x10] sm:$0xff] }
   0x2   :  { %v152_v3 = vpack.c.bf16 %v17_v1, %v16_v0  ;;  %v19_v4 = vld [vmem:[%s229_s1 + $0x18] sm:$0xff]  ;;  %v20_v6 = vld [vmem:[%s229_s1 + $0x20] sm:$0xff]  ;;  %v21_v7 = vld [vmem:[%s229_s1 + $0x28] sm:$0xff] }
   0x3   :  { %v156_v5 = vpack.c.bf16 %v19_v4, %v18_v2  ;;  %v14_v8 = vld [vmem:[%s230_s0] sm:$0xff]  ;;  %v160_v9 = vpack.c.bf16 %v21_v7, %v20_v6  ;;  %v22_v10 = vld [vmem:[%s229_s1 + $0x30] sm:$0xff]  ;;  %v23_v11 = vld [vmem:[%s229_s1 + $0x38] sm:$0xff] }
   0x4   :  { %153 = vmatprep.subr.bf16.mxu0 %v152_v3  ;;  %149 = vmatprep.mubr.msk.f32.mxu0 %vm31_vm0, %v14_v8  ;;  %v164_v12 = vpack.c.bf16 %v23_v11, %v22_v10  ;;  %v15_v13 = vld [vmem:[%s230_s0 + $0x8] sm:$0xff]  ;;  %v120_v14 = vld [vmem:[%s231_s2] ss:$0 sm:$0xff] }
   0x5   :  { %155 = vmatpush3.bf16.msra.mxu0 %v152_v3 }
   0x6   :  { %157 = vmatprep.subr.bf16.mxu0 %v156_v5 }
   0x9   :  { %159 = vmatpush3.bf16.msra.mxu0 %v156_v5 }
   0xa   :  { %161 = vmatprep.subr.bf16.mxu0 %v160_v9 }
   0xd   :  { %163 = vmatpush3.bf16.msra.mxu0 %v160_v9 }
   0xe   :  { %165 = vmatprep.subr.bf16.mxu0 %v164_v12 }
  0x11   :  { %167 = vmatpush3.bf16.msra.mxu0 %v164_v12 }
  0x14   :  { %150 = vmatmul.mubr.msk.f32.vlgmr.msra.gmra.mrb[0].mxu0 %vm31_vm0, %v15_v13 }
  0xe7   :  { %v151_v15 = vpop.f32.mrb[0].mxu0 }
  0xe8   :  { %v110_v16 = vadd.f32 %v151_v15, %v120_v14  ;;  %v104_v17 = vpop.f32.mrb[1].mxu0 }
  0xe9   :  { %v105_v18 = vadd.f32 %v120_v14, %v104_v17 }
  0xea   :  { %115 = vst.msk [vmem:[%s232_s3 + $0x8] sm:$0xff] %vm113_vm1, %v110_v16 }
  0xeb   :  { %114 = vst.msk [vmem:[%s232_s3] sm:$0xff] %vm113_vm1, %v105_v18 }

// kernel: _lambda_.15
= control target key start
LH: loop header
LB: loop body
LE: loop exit
PB: predicated region body
PF: predicated region fallthrough
CT: control target
= control target key end

     0   :  { %vm27_vm0 = vcmask 261120   ;;  %vm109_vm1 = vcmask 523264   ;;  %s191_s1 = inlined_call_operand.vmem [shape: f32[32,64], index: 1, kind: input, shape index: {}]   ;;  %s192_s0 = inlined_call_operand.vmem [shape: f32[16,32], index: 0, kind: input, shape index: {}]   ;;  %s193_s2 = inlined_call_operand.vmem [shape: f32[1,64], index: 2, kind: input, shape index: {}]   ;;  %s194_s3 = inlined_call_operand.vmem [shape: f32[16,64], index: 3, kind: output, shape index: {}]  }
   0x1   :  { %v16_v0 = vld [vmem:[%s191_s1] sm:$0xff]  ;;  %v17_v1 = vld [vmem:[%s191_s1 + $0x8] sm:$0xff]  ;;  %v18_v2 = vld [vmem:[%s191_s1 + $0x10] sm:$0xff] }
   0x2   :  { %v136_v3 = vpack.c.bf16 %v17_v1, %v16_v0  ;;  %v19_v4 = vld [vmem:[%s191_s1 + $0x18] sm:$0xff]  ;;  %v14_v5 = vld [vmem:[%s192_s0] sm:$0xff]  ;;  %v15_v7 = vld [vmem:[%s192_s0 + $0x8] sm:$0xff] }
   0x3   :  { %v140_v6 = vpack.c.bf16 %v19_v4, %v18_v2  ;;  %133 = vmatprep.mubr.msk.f32.mxu0 %vm27_vm0, %v14_v5  ;;  %v116_v8 = vld [vmem:[%s193_s2] ss:$0 sm:$0xff] }
   0x4   :  { %137 = vmatprep.subr.bf16.mxu0 %v136_v3 }
   0x5   :  { %139 = vmatpush3.bf16.msra.mxu0 %v136_v3 }
   0x6   :  { %141 = vmatprep.subr.bf16.mxu0 %v140_v6 }
   0x9   :  { %143 = vmatpush3.bf16.msra.mxu0 %v140_v6 }
   0xc   :  { %134 = vmatmul.mubr.msk.f32.vlgmr.msra.gmra.mrb[0].mxu0 %vm27_vm0, %v15_v7 }
  0xdf   :  { %v135_v9 = vpop.f32.mrb[0].mxu0 }
  0xe0   :  { %v106_v10 = vadd.f32 %v135_v9, %v116_v8  ;;  %v100_v11 = vpop.f32.mrb[1].mxu0 }
  0xe1   :  { %v101_v12 = vadd.f32 %v116_v8, %v100_v11 }
  0xe2   :  { %111 = vst.msk [vmem:[%s194_s3 + $0x8] sm:$0xff] %vm109_vm1, %v106_v10 }
  0xe3   :  { %110 = vst.msk [vmem:[%s194_s3] sm:$0xff] %vm109_vm1, %v101_v12 }

// kernel: _lambda_.20
= control target key start
LH: loop header
LB: loop body
LE: loop exit
PB: predicated region body
PF: predicated region fallthrough
CT: control target
= control target key end

     0   :  { %vm15_vm0 = vcmask 523264   ;;  %s85_s0 = inlined_call_operand.vmem [shape: f32[16,64], index: 0, kind: input, shape index: {}]   ;;  %s86_s1 = inlined_call_operand.vmem [shape: f32[1,64], index: 1, kind: input, shape index: {}]   ;;  %s87_s2 = inlined_call_operand.vmem [shape: f32[16,64], index: 2, kind: output, shape index: {}]  }
   0x1   :  { %v11_v0 = vld [vmem:[%s85_s0] sm:$0xff]  ;;  %v12_v1 = vld [vmem:[%s85_s0 + $0x8] sm:$0xff] }
   0x2   :  { %v13_v2 = vmul.f32 %v11_v0, %v11_v0  ;;  %v14_v3 = vmul.f32 %v12_v1, %v12_v1  ;;  %v46_v13 = vld [vmem:[%s86_s1] ss:$0 sm:$0xff] }
   0x4   :  { %v16_v4 = vsel %vm15_vm0, %v13_v2, 0.0  ;;  %v19_v5 = vsel %vm15_vm0, %v14_v3, 0.0 }
   0x5   :  { %17 = vadd.xlane.f32.xlu0 %v16_v4 }
   0x9   :  { %20 = vadd.xlane.f32.xlu0 %v19_v5 }
  0x92   :  { %v18_v6 = vpop.xlane.xlu0 %17 }
  0x93   :  { %v23_v7 = vmul.f32 0.015625, %v18_v6 }
  0x95   :  { %v25_v8 = vadd.f32 1e-06, %v23_v7 }
  0x96   :  { %v21_v9 = vpop.xlane.xlu0 %20 }
  0x97   :  { %47 = vrsqrt.f32 %v25_v8  ;;  %v24_v10 = vmul.f32 0.015625, %v21_v9 }
  0x99   :  { %v26_v11 = vadd.f32 1e-06, %v24_v10 }
  0x9b   :  { %49 = vrsqrt.f32 %v26_v11 }
  0xa1   :  { %v48_v12 = vpop.eup %47 }
  0xa2   :  { %v29_v14 = vmul.f32 %v48_v12, %v11_v0 }
  0xa4   :  { %v38_v15 = vmul.f32 %v46_v13, %v29_v14 }
  0xa5   :  { %v50_v16 = vpop.eup %49 }
  0xa6   :  { %40 = vst.msk [vmem:[%s87_s2] sm:$0xff] %vm15_vm0, %v38_v15  ;;  %v30_v17 = vmul.f32 %v50_v16, %v12_v1 }
  0xa8   :  { %v39_v18 = vmul.f32 %v46_v13, %v30_v17 }
  0xaa   :  { %41 = vst.msk [vmem:[%s87_s2 + $0x8] sm:$0xff] %vm15_vm0, %v39_v18 }

// kernel: _lambda_.22
= control target key start
LH: loop header
LB: loop body
LE: loop exit
PB: predicated region body
PF: predicated region fallthrough
CT: control target
= control target key end

     0   :  { %vm31_vm0 = vcmask 523264   ;;  %s228_s1 = inlined_call_operand.vmem [shape: f32[64,128], index: 1, kind: input, shape index: {}]   ;;  %s229_s0 = inlined_call_operand.vmem [shape: f32[16,64], index: 0, kind: input, shape index: {}]   ;;  %s230_s2 = inlined_call_operand.vmem [shape: f32[1,128], index: 2, kind: input, shape index: {}]   ;;  %s231_s3 = inlined_call_operand.vmem [shape: f32[16,128], index: 3, kind: output, shape index: {}]  }
   0x1   :  { %v16_v0 = vld [vmem:[%s228_s1] sm:$0xff]  ;;  %v17_v1 = vld [vmem:[%s228_s1 + $0x8] sm:$0xff]  ;;  %v18_v2 = vld [vmem:[%s228_s1 + $0x10] sm:$0xff] }
   0x2   :  { %v151_v3 = vpack.c.bf16 %v17_v1, %v16_v0  ;;  %v19_v4 = vld [vmem:[%s228_s1 + $0x18] sm:$0xff]  ;;  %v20_v6 = vld [vmem:[%s228_s1 + $0x20] sm:$0xff]  ;;  %v21_v7 = vld [vmem:[%s228_s1 + $0x28] sm:$0xff] }
   0x3   :  { %v155_v5 = vpack.c.bf16 %v19_v4, %v18_v2  ;;  %v14_v8 = vld [vmem:[%s229_s0] sm:$0xff]  ;;  %v159_v9 = vpack.c.bf16 %v21_v7, %v20_v6  ;;  %v22_v10 = vld [vmem:[%s228_s1 + $0x30] sm:$0xff]  ;;  %v23_v11 = vld [vmem:[%s228_s1 + $0x38] sm:$0xff] }
   0x4   :  { %152 = vmatprep.subr.bf16.mxu0 %v151_v3  ;;  %148 = vmatprep.mubr.msk.f32.mxu0 %vm31_vm0, %v14_v8  ;;  %v163_v12 = vpack.c.bf16 %v23_v11, %v22_v10  ;;  %v15_v13 = vld [vmem:[%s229_s0 + $0x8] sm:$0xff]  ;;  %v119_v14 = vld [vmem:[%s230_s2] ss:$0 sm:$0xff] }
   0x5   :  { %154 = vmatpush3.bf16.msra.mxu0 %v151_v3 }
   0x6   :  { %156 = vmatprep.subr.bf16.mxu0 %v155_v5 }
   0x9   :  { %158 = vmatpush3.bf16.msra.mxu0 %v155_v5 }
   0xa   :  { %160 = vmatprep.subr.bf16.mxu0 %v159_v9 }
   0xd   :  { %162 = vmatpush3.bf16.msra.mxu0 %v159_v9 }
   0xe   :  { %164 = vmatprep.subr.bf16.mxu0 %v163_v12 }
  0x11   :  { %166 = vmatpush3.bf16.msra.mxu0 %v163_v12 }
  0x14   :  { %149 = vmatmul.mubr.msk.f32.vlgmr.msra.gmra.mrb[0].mxu0 %vm31_vm0, %v15_v13 }
  0xe7   :  { %v150_v15 = vpop.f32.mrb[0].mxu0 }
  0xe8   :  { %v110_v16 = vadd.f32 %v150_v15, %v119_v14  ;;  %v104_v17 = vpop.f32.mrb[1].mxu0 }
  0xe9   :  { %v105_v18 = vadd.f32 %v119_v14, %v104_v17 }
  0xea   :  { %114 = vst [vmem:[%s231_s3 + $0x8] sm:$0xff] %v110_v16 }
  0xeb   :  { %113 = vst [vmem:[%s231_s3] sm:$0xff] %v105_v18 }

// kernel: _lambda_.23
= control target key start
LH: loop header
LB: loop body
LE: loop exit
PB: predicated region body
PF: predicated region fallthrough
CT: control target
= control target key end

     0   :  { %vm114_vm0 = vcmask 523264   ;;  %s290_s1 = inlined_call_operand.vmem [shape: f32[128,64], index: 1, kind: input, shape index: {}]   ;;  %s291_s0 = inlined_call_operand.vmem [shape: f32[16,128], index: 0, kind: input, shape index: {}]   ;;  %s292_s2 = inlined_call_operand.vmem [shape: f32[1,64], index: 2, kind: input, shape index: {}]   ;;  %s293_s3 = inlined_call_operand.vmem [shape: f32[16,64], index: 3, kind: output, shape index: {}]  }
   0x1   :  { %v16_v0 = vld [vmem:[%s290_s1] sm:$0xff]  ;;  %v17_v1 = vld [vmem:[%s290_s1 + $0x8] sm:$0xff]  ;;  %v18_v2 = vld [vmem:[%s290_s1 + $0x10] sm:$0xff] }
   0x2   :  { %v175_v3 = vpack.c.bf16 %v17_v1, %v16_v0  ;;  %v19_v4 = vld [vmem:[%s290_s1 + $0x18] sm:$0xff]  ;;  %v20_v6 = vld [vmem:[%s290_s1 + $0x20] sm:$0xff]  ;;  %v21_v7 = vld [vmem:[%s290_s1 + $0x28] sm:$0xff] }
   0x3   :  { %v179_v5 = vpack.c.bf16 %v19_v4, %v18_v2  ;;  %v183_v8 = vpack.c.bf16 %v21_v7, %v20_v6  ;;  %v14_v9 = vld [vmem:[%s291_s0] sm:$0xff]  ;;  %v22_v10 = vld [vmem:[%s290_s1 + $0x30] sm:$0xff]  ;;  %v23_v11 = vld [vmem:[%s290_s1 + $0x38] sm:$0xff] }
   0x4   :  { %176 = vmatprep.subr.bf16.mxu0 %v175_v3  ;;  %172 = vmatprep.mubr.f32.mxu0 %v14_v9  ;;  %v187_v12 = vpack.c.bf16 %v23_v11, %v22_v10  ;;  %v24_v13 = vld [vmem:[%s290_s1 + $0x40] sm:$0xff]  ;;  %v25_v14 = vld [vmem:[%s290_s1 + $0x48] sm:$0xff]  ;;  %v26_v16 = vld [vmem:[%s290_s1 + $0x50] sm:$0xff] }
   0x5   :  { %178 = vmatpush3.bf16.msra.mxu0 %v175_v3  ;;  %v191_v15 = vpack.c.bf16 %v25_v14, %v24_v13  ;;  %v27_v17 = vld [vmem:[%s290_s1 + $0x58] sm:$0xff]  ;;  %v28_v19 = vld [vmem:[%s290_s1 + $0x60] sm:$0xff]  ;;  %v29_v20 = vld [vmem:[%s290_s1 + $0x68] sm:$0xff] }
   0x6   :  { %180 = vmatprep.subr.bf16.mxu0 %v179_v5  ;;  %v195_v18 = vpack.c.bf16 %v27_v17, %v26_v16  ;;  %v199_v21 = vpack.c.bf16 %v29_v20, %v28_v19  ;;  %v30_v22 = vld [vmem:[%s290_s1 + $0x70] sm:$0xff]  ;;  %v31_v23 = vld [vmem:[%s290_s1 + $0x78] sm:$0xff]  ;;  %v15_v25 = vld [vmem:[%s291_s0 + $0x8] sm:$0xff] }
   0x7   :  { %v203_v24 = vpack.c.bf16 %v31_v23, %v30_v22  ;;  %v121_v26 = vld [vmem:[%s292_s2] ss:$0 sm:$0xff] }
   0x9   :  { %182 = vmatpush3.bf16.msra.mxu0 %v179_v5 }
   0xa   :  { %184 = vmatprep.subr.bf16.mxu0 %v183_v8 }
   0xd   :  { %186 = vmatpush3.bf16.msra.mxu0 %v183_v8 }
   0xe   :  { %188 = vmatprep.subr.bf16.mxu0 %v187_v12 }
  0x11   :  { %190 = vmatpush3.bf16.msra.mxu0 %v187_v12 }
  0x12   :  { %192 = vmatprep.subr.bf16.mxu0 %v191_v15 }
  0x15   :  { %194 = vmatpush3.bf16.msra.mxu0 %v191_v15 }
  0x16   :  { %196 = vmatprep.subr.bf16.mxu0 %v195_v18 }
  0x19   :  { %198 = vmatpush3.bf16.msra.mxu0 %v195_v18 }
  0x1a   :  { %200 = vmatprep.subr.bf16.mxu0 %v199_v21 }
  0x1d   :  { %202 = vmatpush3.bf16.msra.mxu0 %v199_v21 }
  0x1e   :  { %204 = vmatprep.subr.bf16.mxu0 %v203_v24 }
  0x21   :  { %206 = vmatpush3.bf16.msra.mxu0 %v203_v24 }
  0x24   :  { %173 = vmatmul.mubr.f32.vlgmr.msra.gmra.mrb[0].mxu0 %v15_v25 }
  0xf7   :  { %v174_v27 = vpop.f32.mrb[0].mxu0 }
  0xf8   :  { %v111_v28 = vadd.f32 %v174_v27, %v121_v26  ;;  %v105_v29 = vpop.f32.mrb[1].mxu0 }
  0xf9   :  { %v106_v30 = vadd.f32 %v121_v26, %v105_v29 }
  0xfa   :  { %116 = vst.msk [vmem:[%s293_s3 + $0x8] sm:$0xff] %vm114_vm0, %v111_v28 }
  0xfb   :  { %115 = vst.msk [vmem:[%s293_s3] sm:$0xff] %vm114_vm0, %v106_v30 }

</bundles_post_ra>
